<compile_context>
chip_gen: v5e
topology: v5e:2x2
jax: 0.10.0
libtpu: 0.0.40
codegen_flags: <defaults>
</compile_context>

<pallas_src>
import math
import functools

import numpy as np
import jax
import jax.numpy as jnp
from jax import lax
from jax.experimental import pallas as pl
from jax.experimental.pallas import tpu as pltpu


# ----------------------------------------------------------------------------
# Parameter / buffer construction (glue, plain numpy — matches torch __init__)
# ----------------------------------------------------------------------------
def make_positional_encoding(d_model: int, max_len: int = 5000) -> jnp.ndarray:
    position = np.arange(max_len, dtype=np.float32)[:, None]              # [max_len, 1]
    div_term = np.exp(
        np.arange(0, d_model, 2, dtype=np.float32) * (-math.log(10000.0) / d_model)
    )                                                                     # [d_model/2]
    pe = np.zeros((max_len, 1, d_model), dtype=np.float32)
    pe[:, 0, 0::2] = np.sin(position * div_term)
    pe[:, 0, 1::2] = np.cos(position * div_term)
    return jnp.asarray(pe)


# ----------------------------------------------------------------------------
# Pallas kernel: out = dropout(x + pe)  on lane-dense (tS, B*D) blocks
# ----------------------------------------------------------------------------
def _pe_kernel(seed_ref, x_ref, pe_ref, out_ref, *, batch: int, p: float,
               training: bool, seq_block: int):
    x = x_ref[...]                                   # (tS, B*D)
    pe_tile = pe_ref[...].astype(x.dtype)            # (tS, D)
    y = x + jnp.tile(pe_tile, (1, batch))            # broadcast pe across batch lanes

    if training and p >= 1.0:
        y = jnp.zeros_like(y)
    elif training and p > 0.0:
        # Stateless integer-hash PRNG keyed on (seed, absolute row, lane):
        # tiling-invariant and lowers everywhere (no pltpu.prng_*).
        row0 = (pl.program_id(0) * seq_block).astype(jnp.uint32)
        rows = lax.broadcasted_iota(jnp.uint32, y.shape, 0) + row0
        cols = lax.broadcasted_iota(jnp.uint32, y.shape, 1)
        seed = seed_ref[0].astype(jnp.uint32)

        h = seed + rows * jnp.uint32(0x9E3779B9) + cols * jnp.uint32(0x85EBCA6B)
        h = h ^ (h >> 16)
        h = h * jnp.uint32(0x7FEB352D)
        h = h ^ (h >> 15)
        h = h * jnp.uint32(0x846CA68B)
        h = h ^ (h >> 16)

        # Integer threshold compare (keep prob = 1 - p): no float cast/multiply.
        threshold = jnp.uint32(min(int(round(p * 2.0 ** 32)), 2 ** 32 - 1))
        keep = h >= threshold
        scale = jnp.asarray(1.0 / (1.0 - p), dtype=y.dtype)
        y = jnp.where(keep, y * scale, jnp.zeros_like(y))

    out_ref[...] = y.astype(out_ref.dtype)


def positional_encoding_forward(
    x: jnp.ndarray,
    pe: jnp.ndarray,
    *,
    p: float = 0.1,
    training: bool = False,
    seed: int = 0,
    seq_block: int | None = None,
) -> jnp.ndarray:
    """x: [S, B, D];  pe: [max_len, 1, D] float32."""
    S, B, D = x.shape
    max_len = pe.shape[0]
    assert S <= max_len, "seq_len exceeds the positional-encoding buffer"
    out_dtype = x.dtype

    # Free reshapes to a lane-dense 2-D layout.
    x2d = x.reshape(S, B * D)
    pe2d = pe.reshape(max_len, D)[:S]

    # Seq tile: ~2 MiB of x per block, sublane-aligned (multiple of 8), capped
    # at the (8-rounded) sequence length.  Total double-buffered VMEM is about
    # 2 * (x + out + pe) blocks ~ 8-9 MiB at the default -> fits every gen.
    row_bytes = B * D * x.dtype.itemsize
    if seq_block is None:
        seq_block = (2 << 20) // max(int(row_bytes), 1)
        seq_block = max(8, min(2048, (seq_block // 8) * 8))
    seq_block = int(max(8, (seq_block // 8) * 8))
    s_cap = ((S + 7) // 8) * 8
    seq_block = min(seq_block, s_cap)

    # Pad the seq axis so the grid tiles it exactly (ragged tail handled here).
    S_pad = pl.cdiv(S, seq_block) * seq_block
    if S_pad != S:
        x2d = jnp.pad(x2d, ((0, S_pad - S), (0, 0)))
        pe2d = jnp.pad(pe2d, ((0, S_pad - S), (0, 0)))

    grid = (S_pad // seq_block,)
    seed_arr = jnp.asarray([seed], dtype=jnp.int32)

    kernel = functools.partial(
        _pe_kernel, batch=B, p=float(p), training=bool(training), seq_block=seq_block
    )

    out2d = pl.pallas_call(
        kernel,
        out_shape=jax.ShapeDtypeStruct((S_pad, B * D), out_dtype),
        grid_spec=pltpu.PrefetchScalarGridSpec(
            num_scalar_prefetch=1,                # seed lands in SMEM
            grid=grid,
            in_specs=[
                pl.BlockSpec((seq_block, B * D), lambda i, seed_ref: (i, 0)),
                pl.BlockSpec((seq_block, D), lambda i, seed_ref: (i, 0)),
            ],
            out_specs=pl.BlockSpec((seq_block, B * D), lambda i, seed_ref: (i, 0)),
        ),
        compiler_params=pltpu.CompilerParams(
            dimension_semantics=("parallel",),    # grid steps are independent
        ),
    )(seed_arr, x2d, pe2d)

    return out2d[:S].reshape(S, B, D)


# ----------------------------------------------------------------------------
# Demo / correctness check
# ----------------------------------------------------------------------------
if __name__ == "__main__":
    d_model = 32
    max_len = 64
    seq_len = 8
    batch = 2
    dropout_p = 0.1

    key = jax.random.PRNGKey(0)
    x = jax.random.normal(key, (seq_len, batch, d_model), dtype=jnp.float32)
    pe = make_positional_encoding(d_model, max_len)

    # Eval-mode forward (dropout is identity -> matches PyTorch module.eval()).
    out = positional_encoding_forward(x, pe, p=dropout_p, training=False)
    out = jax.block_until_ready(out)
    ref = x + pe[:seq_len]
    np.testing.assert_allclose(np.asarray(out), np.asarray(ref), rtol=1e-6, atol=1e-6)

    # Training-mode dropout: in-kernel stateless hash PRNG (different RNG stream
    # than torch).  Every element must be either 0 or ref * 1/(1-p).
    out_train = positional_encoding_forward(x, pe, p=dropout_p, training=True, seed=1234)
    out_train = jax.block_until_ready(out_train)
    ot = np.asarray(out_train)
    ref_scaled = np.asarray(ref) * np.float32(1.0 / (1.0 - dropout_p))
    ok = (np.abs(ot) <= 1e-6) | (np.abs(ot - ref_scaled) <= 1e-4 + 1e-4 * np.abs(ref_scaled))
    assert ok.all(), "training-mode dropout output mismatch"

    print("KERNEL_OK")
</pallas_src>

<mosaic_0001>
module attributes {stable_mosaic.version = 11 : i64} {
  func.func @_pe_kernel(%arg0: i32, %arg1: memref<1xi32, #tpu.memory_space<smem>>, %arg2: memref<8x64xf32, #tpu.memory_space<vmem>>, %arg3: memref<8x32xf32, #tpu.memory_space<vmem>>, %arg4: memref<8x64xf32, #tpu.memory_space<vmem>>) attributes {dimension_semantics = [#tpu.dimension_semantics<parallel>], iteration_bounds = array<i64: 1>, scalar_prefetch = 1 : i64, scratch_operands = 0 : i64, tpu.core_type = #tpu.core_type<tc>, window_params = [{transform_indices = @transform_0, window_bounds = array<i64: 8, 64>}, {transform_indices = @transform_1, window_bounds = array<i64: 8, 32>}, {transform_indices = @transform_2, window_bounds = array<i64: 8, 64>}]} {
    %c0 = arith.constant 0 : index
    %c0_0 = arith.constant 0 : index
    %0 = vector.load %arg2[%c0, %c0_0] : memref<8x64xf32, #tpu.memory_space<vmem>>, vector<8x64xf32>
    %c0_1 = arith.constant 0 : index
    %c0_2 = arith.constant 0 : index
    %1 = vector.load %arg3[%c0_1, %c0_2] : memref<8x32xf32, #tpu.memory_space<vmem>>, vector<8x32xf32>
    %2 = tpu.concatenate %1, %1 in 1 : vector<8x32xf32>, vector<8x32xf32> -> vector<8x64xf32>
    %3 = arith.addf %0, %2 : vector<8x64xf32>
    %c0_3 = arith.constant 0 : index
    %c0_4 = arith.constant 0 : index
    %4 = vector.load %arg4[%c0_3, %c0_4] : memref<8x64xf32, #tpu.memory_space<vmem>>, vector<8x64xf32>
    tpu.vector_store %arg4[%c0_3, %c0_4], %3 {strides = array<i32>} : memref<8x64xf32, #tpu.memory_space<vmem>>, vector<8x64xf32>,
    return
  }
  func.func @transform_0(%arg0: i32, %arg1: memref<1xi32, #tpu.memory_space<smem>>) -> (i32, i32) {
    %c0_i32 = arith.constant 0 : i32
    %c0_i32_0 = arith.constant 0 : i32
    return %arg0, %c0_i32 : i32, i32
  }
  func.func @transform_1(%arg0: i32, %arg1: memref<1xi32, #tpu.memory_space<smem>>) -> (i32, i32) {
    %c0_i32 = arith.constant 0 : i32
    %c0_i32_0 = arith.constant 0 : i32
    return %arg0, %c0_i32 : i32, i32
  }
  func.func @transform_2(%arg0: i32, %arg1: memref<1xi32, #tpu.memory_space<smem>>) -> (i32, i32) {
    %c0_i32 = arith.constant 0 : i32
    %c0_i32_0 = arith.constant 0 : i32
    return %arg0, %c0_i32 : i32, i32
  }
}

</mosaic_0001>

<bundles_post_ra>
// kernel: tpu_custom_call.1
= control target key start
LH: loop header
LB: loop body
LE: loop exit
PB: predicated region body
PF: predicated region fallthrough
CT: control target
= control target key end

     0   :  { %9 = vsyncpa [#allocation5], 0  ;;  %s186_s0 = inlined_call_operand.<no memory space> [shape: s32[1], index: 0, kind: input, shape index: {}]   ;;  %s187_s1 = inlined_call_operand.hbm [shape: f32[8,64], index: 1, kind: input, shape index: {}]   ;;  %s188_s2 = inlined_call_operand.hbm [shape: f32[8,32], index: 2, kind: input, shape index: {}]   ;;  %s189_s3 = inlined_call_operand.hbm [shape: f32[8,64], index: 3, kind: output, shape index: {}]  }
   0x1   :  { %10 = vsyncpa [#allocation8], 0 }
   0x2   :  { %11 = vsyncpa [#allocation6], 0  ;;  %s17_s14 = sshll.u32 %s187_s1, 4  ;;  %s153_s15 = smov [#allocation4]   ;;  %s18_s14 = int_to_ptr.hbm [resolvable:$true] %s17_s14 }
   0x3   :  { %s19_s16 = sshll.u32 %s153_s15, 4  ;;  %s28_s18 = sshll.u32 %s188_s2, 4  ;;  %s20_s16 = int_to_ptr.vmem [resolvable:$true] %s19_s16  ;;  %s29_s18 = int_to_ptr.hbm [resolvable:$true] %s28_s18 }
   0x4   :  { %22 = dma.hbm_to_vmem [thread:$0]  %s18_s14, 128, %s20_s16, [#allocation5]  }
   0x5   :  { %s154_s19 = smov [#allocation7]  }
   0x6   :  { %s30_s20 = sshll.u32 %s154_s19, 4  ;;  %s31_s20 = int_to_ptr.vmem [resolvable:$true] %s30_s20 }
   0x7   :  { %33 = dma.hbm_to_vmem [thread:$0]  %s29_s18, 128, %s31_s20, [#allocation8]  }
   0x8   :  { %147 = dma.done.wait [#allocation5], 128  }
   0x9   :  { %148 = vsyncadd [#allocation5], 4294967168 }
   0xa   :  { %149 = dma.done.wait [#allocation8], 128  }
   0xb   :  { %150 = vsyncadd [#allocation8], 4294967168  ;;  %v43_v0 = vld [vmem:[#allocation7] sm:$0xff]  ;;  %s155_s1 = smov 32   ;;  %vm48_vm0 = vcmask 261120   ;;  %v42_v1 = vld [vmem:[#allocation4] sm:$0xff] }
   0xc   :  { %45 = vrot.lane.b32.xlu0 %v43_v0, %s155_s1  ;;  %s156_s21 = smov [#allocation9]   ;;  %s60_s2 = sshll.u32 %s189_s3, 4  ;;  %vm51_vm1 = vcmask 523264   ;;  %s61_s2 = int_to_ptr.hbm [resolvable:$true] %s60_s2 }
   0xd   :  { %s58_s22 = sshll.u32 %s156_s21, 4  ;;  %s59_s22 = int_to_ptr.vmem [resolvable:$true] %s58_s22 }
  0x7e   :  { %v46_v2 = vpop.permute.xlu0 %45 }
  0x7f   :  { %v49_v3 = vsel %vm48_vm0, %v43_v0, %v46_v2 }
  0x80   :  { %v50_v4 = vadd.f32 %v49_v3, %v42_v1 }
  0x82   :  { %52 = vst.msk [vmem:[#allocation9] sm:$0xff] %vm51_vm1, %v50_v4 }
  0x83   :  { %63 = dma.vmem_to_hbm [thread:$0]  %s59_s22, 128, %s61_s2, [#allocation6]  }
  0x84   :  { %151 = dma.done.wait [#allocation6], 128  }
  0x85   :  { %152 = vsyncadd [#allocation6], 4294967168 }
  0x86   :  { %68 = vsyncpa [#allocation5], 1 }
  0x87   :  { %69 = vsyncpa [#allocation8], 1 }
  0x88   :  { %70 = vsyncpa [#allocation6], 1 }

</bundles_post_ra>
